<compile_context>
chip_gen: v5e
topology: v5e:2x2
jax: 0.10.0
libtpu: 0.0.40
codegen_flags: <defaults>
</compile_context>

<pallas_src>
import math
from functools import partial

import jax
import jax.numpy as jnp
from jax.experimental import pallas as pl
from jax.experimental.pallas import tpu as pltpu


def _round_up(x, m):
    return ((x + m - 1) // m) * m


def _vmem_budget_bytes():
    """~70% of physical VMEM (128 MiB on v5e/v6e, 64 MiB on v7x); conservative
    64 MiB fallback when the query is unavailable."""
    cap = 64 * 1024 * 1024
    try:
        info = pltpu.get_tpu_info()
        cap = int(getattr(info, "vmem_capacity_bytes", cap)) or cap
    except Exception:
        pass
    return int(cap * 0.70)


# ---------------------------------------------------------------------------
# Kernel bodies
# ---------------------------------------------------------------------------

def _support_kernel(v_ref, w_ref, s_ref):
    # support row tile = vertex_tile @ W (f32 matmul, rounded once on store).
    s_ref[...] = jnp.dot(v_ref[...], w_ref[...],
                         preferred_element_type=jnp.float32).astype(s_ref.dtype)


def _gc_kernel(*refs, apply_w, x_resident, tk, compute_dtype):
    # grid = (row tiles i, reduction tiles k over the N columns of adj)
    if apply_w:
        x_ref, adj_ref, w_ref, b_ref, out_ref, acc_ref = refs
    else:
        x_ref, adj_ref, b_ref, out_ref, acc_ref = refs
        w_ref = None

    k = pl.program_id(1)

    @pl.when(k == 0)
    def _init():
        acc_ref[...] = jnp.zeros_like(acc_ref)

    # adj tile: cast to the MXU compute dtype inside the kernel (fused with
    # the tile load -- no standalone wrapper-side HBM convert pass).
    a = adj_ref[...]
    if a.dtype != compute_dtype:
        a = a.astype(compute_dtype)

    if x_resident:
        # x lives fully in VMEM (fetched once); slice out the current k-tile.
        start = pl.multiple_of(k * tk, tk)
        xk = x_ref[pl.ds(start, tk), :]
    else:
        xk = x_ref[...]

    # acc += adj[i, k] @ x[k]   (bf16 x bf16 on the MXU, f32 accumulate)
    acc_ref[...] += jnp.dot(a, xk, preferred_element_type=jnp.float32)

    @pl.when(k == pl.num_programs(1) - 1)
    def _finalize():
        acc = acc_ref[...]
        if apply_w:
            # Tiny per-row-tile matmul, done in f32 (W kept in f32) so the
            # large accumulated sum is never rounded down to bf16.
            acc = jnp.dot(acc, w_ref[...], preferred_element_type=jnp.float32)
        out_ref[...] = (acc + b_ref[...]).astype(out_ref.dtype)


# ---------------------------------------------------------------------------
# Wrapper
# ---------------------------------------------------------------------------

def gc_layer(vertex, adj, weights, bias, *, tm=None, tk=None,
             compute_dtype=jnp.bfloat16, vmem_limit_bytes=None):
    """out = adj @ (vertex @ weights) + bias  (GCLayer.forward, dense adj)."""
    n, f_in = vertex.shape
    f_in_w, f_out = weights.shape
    assert f_in_w == f_in and adj.shape == (n, n) and bias.shape == (f_out,)

    cdt = jnp.dtype(compute_dtype)
    budget = vmem_limit_bytes if vmem_limit_bytes is not None else _vmem_budget_bytes()
    big_vmem = budget >= 80 * 1024 * 1024

    # Lane-dense feature axes: pad both f_in and f_out to multiples of 128.
    f_in_pad = _round_up(f_in, 128)
    f_out_pad = _round_up(f_out, 128)

    # Algebra pick on the *padded* widths (equal MXU passes -> prefer the
    # order that avoids the extra support HBM round-trip).
    apply_w = f_in_pad <= f_out_pad
    acc_width = f_in_pad if apply_w else f_out_pad

    # ---- tile selection (bounded, 128-aligned; never fall back to full N) --
    tm_target = tm if tm is not None else (512 if big_vmem else 256)
    tk_target = tk if tk is not None else (1024 if big_vmem else 512)

    tm_ = n if n <= tm_target else tm_target
    # keep >=2 row tiles when cheap so both v7x TensorCores get work
    if tm_ == n and n >= 256 and (n // 2) % 128 == 0:
        tm_ = n // 2
    tk_ = n if n <= tk_target else tk_target

    n_rows = _round_up(n, tm_)      # padded adj rows / output rows
    n_cols = _round_up(n, tk_)      # padded adj cols / x rows
    row_tiles = n_rows // tm_
    k_tiles = n_cols // tk_

    # ---- operand prep (all padding done once, in the wrapper) --------------
    # adj: if N needs padding we must copy anyway, so fold the bf16 cast into
    # that copy; otherwise pass adj through untouched (cast per tile in-kernel).
    if n_rows != n or n_cols != n:
        adj_in = jnp.zeros((n_rows, n_cols), cdt).at[:n, :n].set(adj.astype(cdt))
    else:
        adj_in = adj

    v32 = vertex.astype(jnp.float32)
    if f_in_pad != f_in or n_cols != n:
        v_p = jnp.zeros((n_cols, f_in_pad), jnp.float32).at[:n, :f_in].set(v32)
    else:
        v_p = v32

    w32 = weights.astype(jnp.float32)
    if f_in_pad != f_in or f_out_pad != f_out:
        w_p = jnp.zeros((f_in_pad, f_out_pad), jnp.float32).at[:f_in, :f_out].set(w32)
    else:
        w_p = w32

    b_p = jnp.zeros((1, f_out_pad), jnp.float32).at[0, :f_out].set(
        bias.astype(jnp.float32))

    if apply_w:
        # out = (adj @ vertex) @ W + b : stream/reside vertex (f_in_pad wide).
        x = v_p.astype(cdt)
    else:
        # out = adj @ (vertex @ W) + b : materialise support exactly once.
        tsm = tk_
        x = pl.pallas_call(
            _support_kernel,
            out_shape=jax.ShapeDtypeStruct((n_cols, f_out_pad), cdt),
            grid_spec=pltpu.PrefetchScalarGridSpec(
                num_scalar_prefetch=0,
                grid=(n_cols // tsm,),
                in_specs=[pl.BlockSpec((tsm, f_in_pad), lambda i: (i, 0)),
                          pl.BlockSpec((f_in_pad, f_out_pad), lambda i: (0, 0))],
                out_specs=pl.BlockSpec((tsm, f_out_pad), lambda i: (i, 0)),
            ),
            compiler_params=pltpu.CompilerParams(
                dimension_semantics=("parallel",),
                vmem_limit_bytes=budget),
            cost_estimate=pl.CostEstimate(
                flops=2 * n_cols * f_in_pad * f_out_pad, transcendentals=0,
                bytes_accessed=(v_p.size + w_p.size) * 4
                               + n_cols * f_out_pad * cdt.itemsize),
        )(v_p, w_p)

    # ---- VMEM residency decision for x --------------------------------------
    adj_item = jnp.dtype(adj_in.dtype).itemsize
    x_item = cdt.itemsize

    def _working_set(x_rows, adj_bufs):
        b = tm_ * tk_ * adj_item * adj_bufs        # adj tiles
        b += x_rows * acc_width * x_item * 2       # x (double-buffer allocation)
        b += tm_ * acc_width * 4                   # f32 accumulator scratch
        b += tm_ * f_out_pad * 4 * 2               # output tile
        if apply_w:
            b += f_in_pad * f_out_pad * 4 * 2      # resident f32 W
        b += f_out_pad * 4 * 2                     # bias
        return b

    x_resident = k_tiles > 1 and _working_set(n_cols, 3) <= budget
    x_rows = n_cols if x_resident else tk_

    if x_resident:
        x_spec = pl.BlockSpec((n_cols, acc_width), lambda i, k: (0, 0))
    else:
        x_spec = pl.BlockSpec((tk_, acc_width), lambda i, k: (k, 0))

    deep_buffer = (row_tiles * k_tiles >= 4) and _working_set(x_rows, 3) <= budget

    def _adj_spec(buffers):
        if buffers > 2:
            try:
                return pl.BlockSpec((tm_, tk_), lambda i, k: (i, k),
                                    pipeline_mode=pl.Buffered(buffers))
            except Exception:
                pass
        return pl.BlockSpec((tm_, tk_), lambda i, k: (i, k))

    kernel = partial(_gc_kernel, apply_w=apply_w, x_resident=x_resident,
                     tk=tk_, compute_dtype=cdt)

    flops = 2 * n_rows * n_cols * acc_width
    if apply_w:
        flops += 2 * n_rows * f_in_pad * f_out_pad
    bytes_accessed = (n_rows * n_cols * adj_item
                      + x.size * x_item * (1 if x_resident else row_tiles)
                      + w_p.size * 4 + b_p.size * 4
                      + n_rows * f_out_pad * 4)

    def _run(adj_spec):
        in_specs = [x_spec, adj_spec]
        inputs = [x, adj_in]
        if apply_w:
            in_specs.append(pl.BlockSpec((f_in_pad, f_out_pad), lambda i, k: (0, 0)))
            inputs.append(w_p)
        in_specs.append(pl.BlockSpec((1, f_out_pad), lambda i, k: (0, 0)))
        inputs.append(b_p)
        return pl.pallas_call(
            kernel,
            out_shape=jax.ShapeDtypeStruct((n_rows, f_out_pad), jnp.float32),
            grid_spec=pltpu.PrefetchScalarGridSpec(
                num_scalar_prefetch=0,
                grid=(row_tiles, k_tiles),
                in_specs=in_specs,
                out_specs=pl.BlockSpec((tm_, f_out_pad), lambda i, k: (i, 0)),
                scratch_shapes=[pltpu.VMEM((tm_, acc_width), jnp.float32)],
            ),
            compiler_params=pltpu.CompilerParams(
                dimension_semantics=("parallel", "arbitrary"),
                vmem_limit_bytes=budget),
            cost_estimate=pl.CostEstimate(
                flops=flops, transcendentals=0, bytes_accessed=bytes_accessed),
        )(*inputs)

    if deep_buffer:
        # 3-deep adj buffering hides DMA jitter at row-tile boundaries; fall
        # back to default double-buffering if this JAX build rejects it.
        try:
            out_pad = _run(_adj_spec(3))
        except Exception:
            out_pad = _run(_adj_spec(2))
    else:
        out_pad = _run(_adj_spec(2))

    if n_rows != n or f_out_pad != f_out:
        return out_pad[:n, :f_out]
    return out_pad


def gc_layer_ref(vertex, adj, weights, bias):
    return adj @ (vertex @ weights) + bias


def _check(name, out, ref, tol):
    err = float(jnp.max(jnp.abs(out - ref)) / (jnp.max(jnp.abs(ref)) + 1e-6))
    assert err < tol, f"{name}: relative error {err} >= {tol}"


if __name__ == "__main__":
    key = jax.random.PRNGKey(0)

    # --- primary small test (matches the module's reset_parameters init) ----
    N, IN_F, OUT_F = 16, 16, 32
    k_v, k_a, k_w, key = jax.random.split(key, 4)
    vertex = jax.random.normal(k_v, (N, IN_F), dtype=jnp.float32)
    adj = jax.random.uniform(k_a, (N, N), dtype=jnp.float32)
    stdv = 1.0 / math.sqrt(OUT_F)
    weights = jax.random.uniform(k_w, (IN_F, OUT_F), dtype=jnp.float32,
                                 minval=-stdv, maxval=stdv)
    bias = jnp.zeros((OUT_F,), dtype=jnp.float32)
    ref = gc_layer_ref(vertex, adj, weights, bias)

    out = jax.block_until_ready(gc_layer(vertex, adj, weights, bias))
    assert out.shape == (N, OUT_F)
    _check("small_bf16", out, ref, 2e-2)

    out32 = jax.block_until_ready(
        gc_layer(vertex, adj, weights, bias, compute_dtype=jnp.float32))
    _check("small_f32", out32, ref, 1e-5)

    # --- multi row-tile test: exercises the (i, k) grid + f32 accumulator ---
    N2, IN2, OUT2 = 1024, 64, 256
    k_v, k_a, k_w, k_b, key = jax.random.split(key, 5)
    v2 = jax.random.normal(k_v, (N2, IN2), dtype=jnp.float32)
    a2 = jax.random.uniform(k_a, (N2, N2), dtype=jnp.float32)
    s2 = 1.0 / math.sqrt(OUT2)
    w2 = jax.random.uniform(k_w, (IN2, OUT2), dtype=jnp.float32,
                            minval=-s2, maxval=s2)
    b2 = jax.random.normal(k_b, (OUT2,), dtype=jnp.float32) * 0.1
    out2 = jax.block_until_ready(gc_layer(v2, a2, w2, b2))
    _check("tiled_bf16", out2, gc_layer_ref(v2, a2, w2, b2), 2e-2)

    # --- f_in > f_out: support precomputed once in its own pallas_call ------
    N3, IN3, OUT3 = 384, 256, 64
    k_v, k_a, k_w, k_b, key = jax.random.split(key, 5)
    v3 = jax.random.normal(k_v, (N3, IN3), dtype=jnp.float32)
    a3 = jax.random.uniform(k_a, (N3, N3), dtype=jnp.float32)
    s3 = 1.0 / math.sqrt(OUT3)
    w3 = jax.random.uniform(k_w, (IN3, OUT3), dtype=jnp.float32,
                            minval=-s3, maxval=s3)
    b3 = jax.random.normal(k_b, (OUT3,), dtype=jnp.float32) * 0.1
    out3 = jax.block_until_ready(gc_layer(v3, a3, w3, b3))
    _check("support_path_bf16", out3, gc_layer_ref(v3, a3, w3, b3), 2e-2)

    # --- non-divisible N, forced small tiles: zero-padding + VMEM-resident x
    N4, IN4, OUT4 = 600, 72, 40
    k_v, k_a, k_w, k_b, key = jax.random.split(key, 5)
    v4 = jax.random.normal(k_v, (N4, IN4), dtype=jnp.float32)
    a4 = jax.random.uniform(k_a, (N4, N4), dtype=jnp.float32)
    s4 = 1.0 / math.sqrt(OUT4)
    w4 = jax.random.uniform(k_w, (IN4, OUT4), dtype=jnp.float32,
                            minval=-s4, maxval=s4)
    b4 = jax.random.normal(k_b, (OUT4,), dtype=jnp.float32) * 0.1
    out4 = jax.block_until_ready(gc_layer(v4, a4, w4, b4, tm=256, tk=256))
    assert out4.shape == (N4, OUT4)
    _check("padded_resident_bf16", out4, gc_layer_ref(v4, a4, w4, b4), 2e-2)

    print("KERNEL_OK")
</pallas_src>

<mosaic_0001>
module attributes {stable_mosaic.version = 11 : i64} {
  func.func @_gc_kernel(%arg0: i32, %arg1: i32, %arg2: memref<16x128xbf16, #tpu.memory_space<vmem>>, %arg3: memref<16x16xf32, #tpu.memory_space<vmem>>, %arg4: memref<128x128xf32, #tpu.memory_space<vmem>>, %arg5: memref<1x128xf32, #tpu.memory_space<vmem>>, %arg6: memref<16x128xf32, #tpu.memory_space<vmem>>, %arg7: memref<16x128xf32, #tpu.memory_space<vmem>>) attributes {dimension_semantics = [#tpu.dimension_semantics<parallel>, #tpu.dimension_semantics<arbitrary>], iteration_bounds = array<i64: 1, 1>, scalar_prefetch = 0 : i64, scratch_operands = 1 : i64, tpu.core_type = #tpu.core_type<tc>, window_params = [{transform_indices = @transform_0, window_bounds = array<i64: 16, 128>}, {transform_indices = @transform_1, window_bounds = array<i64: 16, 16>}, {pipeline_mode = #tpu.pipeline_mode<synchronous>, transform_indices = @transform_2, window_bounds = array<i64: 128, 128>}, {pipeline_mode = #tpu.pipeline_mode<synchronous>, transform_indices = @transform_3, window_bounds = array<i64: 1, 128>}, {transform_indices = @transform_4, window_bounds = array<i64: 16, 128>}]} {
    %c0_i32 = arith.constant 0 : i32
    %0 = arith.cmpi eq, %arg1, %c0_i32 : i32
    %1 = arith.extui %0 : i1 to i32
    %c0_i32_0 = arith.constant 0 : i32
    %2 = arith.cmpi ne, %1, %c0_i32_0 : i32
    scf.if %2 {
      %cst_10 = arith.constant 0.000000e+00 : f32
      %13 = vector.broadcast %cst_10 : f32 to vector<16x128xf32>
      %c0_11 = arith.constant 0 : index
      %c0_12 = arith.constant 0 : index
      %14 = vector.load %arg7[%c0_11, %c0_12] : memref<16x128xf32, #tpu.memory_space<vmem>>, vector<16x128xf32>
      tpu.vector_store %arg7[%c0_11, %c0_12], %13 {strides = array<i32>} : memref<16x128xf32, #tpu.memory_space<vmem>>, vector<16x128xf32>,
    } else {
    }
    %c0 = arith.constant 0 : index
    %c0_1 = arith.constant 0 : index
    %3 = vector.load %arg3[%c0, %c0_1] : memref<16x16xf32, #tpu.memory_space<vmem>>, vector<16x16xf32>
    %4 = arith.truncf %3 : vector<16x16xf32> to vector<16x16xbf16>
    %c0_2 = arith.constant 0 : index
    %c0_3 = arith.constant 0 : index
    %5 = vector.load %arg2[%c0_2, %c0_3] : memref<16x128xbf16, #tpu.memory_space<vmem>>, vector<16x128xbf16>
    %c0_4 = arith.constant 0 : index
    %c0_5 = arith.constant 0 : index
    %6 = vector.load %arg7[%c0_4, %c0_5] : memref<16x128xf32, #tpu.memory_space<vmem>>, vector<16x128xf32>
    %cst = arith.constant dense<0.000000e+00> : vector<16x128xf32>
    %7 = tpu.matmul %4, %5, %cst {dimension_numbers = #tpu.dot_dimension_numbers<[1], [0], [0], [1], [0, 0, 1, 1], [], []>} : vector<16x16xbf16>, vector<16x128xbf16>, vector<16x128xf32> -> vector<16x128xf32>
    %8 = arith.addf %6, %7 : vector<16x128xf32>
    %c0_6 = arith.constant 0 : index
    %c0_7 = arith.constant 0 : index
    %9 = vector.load %arg7[%c0_6, %c0_7] : memref<16x128xf32, #tpu.memory_space<vmem>>, vector<16x128xf32>
    tpu.vector_store %arg7[%c0_6, %c0_7], %8 {strides = array<i32>} : memref<16x128xf32, #tpu.memory_space<vmem>>, vector<16x128xf32>,
    %c0_i32_8 = arith.constant 0 : i32
    %10 = arith.cmpi eq, %arg1, %c0_i32_8 : i32
    %11 = arith.extui %10 : i1 to i32
    %c0_i32_9 = arith.constant 0 : i32
    %12 = arith.cmpi ne, %11, %c0_i32_9 : i32
    scf.if %12 {
      %c0_10 = arith.constant 0 : index
      %c0_11 = arith.constant 0 : index
      %13 = vector.load %arg7[%c0_10, %c0_11] : memref<16x128xf32, #tpu.memory_space<vmem>>, vector<16x128xf32>
      %c0_12 = arith.constant 0 : index
      %c0_13 = arith.constant 0 : index
      %14 = vector.load %arg4[%c0_12, %c0_13] : memref<128x128xf32, #tpu.memory_space<vmem>>, vector<128x128xf32>
      %cst_14 = arith.constant dense<0.000000e+00> : vector<16x128xf32>
      %15 = tpu.matmul %13, %14, %cst_14 {dimension_numbers = #tpu.dot_dimension_numbers<[1], [0], [0], [1], [0, 0, 1, 1], [], []>} : vector<16x128xf32>, vector<128x128xf32>, vector<16x128xf32> -> vector<16x128xf32>
      %c0_15 = arith.constant 0 : index
      %c0_16 = arith.constant 0 : index
      %16 = vector.load %arg5[%c0_15, %c0_16] : memref<1x128xf32, #tpu.memory_space<vmem>>, vector<1x128xf32>
      %17 = vector.broadcast %16 : vector<1x128xf32> to vector<16x128xf32>
      %18 = arith.addf %15, %17 : vector<16x128xf32>
      %c0_17 = arith.constant 0 : index
      %c0_18 = arith.constant 0 : index
      %19 = vector.load %arg6[%c0_17, %c0_18] : memref<16x128xf32, #tpu.memory_space<vmem>>, vector<16x128xf32>
      tpu.vector_store %arg6[%c0_17, %c0_18], %18 {strides = array<i32>} : memref<16x128xf32, #tpu.memory_space<vmem>>, vector<16x128xf32>,
    } else {
    }
    return
  }
  func.func @transform_0(%arg0: i32, %arg1: i32) -> (i32, i32) {
    %c0_i32 = arith.constant 0 : i32
    %c0_i32_0 = arith.constant 0 : i32
    return %arg1, %c0_i32 : i32, i32
  }
  func.func @transform_1(%arg0: i32, %arg1: i32) -> (i32, i32) {
    %c0_i32 = arith.constant 0 : i32
    return %arg0, %arg1 : i32, i32
  }
  func.func @transform_2(%arg0: i32, %arg1: i32) -> (i32, i32) {
    %c0_i32 = arith.constant 0 : i32
    %c0_i32_0 = arith.constant 0 : i32
    %c0_i32_1 = arith.constant 0 : i32
    return %c0_i32, %c0_i32_0 : i32, i32
  }
  func.func @transform_3(%arg0: i32, %arg1: i32) -> (i32, i32) {
    %c0_i32 = arith.constant 0 : i32
    %c0_i32_0 = arith.constant 0 : i32
    %c0_i32_1 = arith.constant 0 : i32
    return %c0_i32, %c0_i32_0 : i32, i32
  }
  func.func @transform_4(%arg0: i32, %arg1: i32) -> (i32, i32) {
    %c0_i32 = arith.constant 0 : i32
    %c0_i32_0 = arith.constant 0 : i32
    return %arg0, %c0_i32 : i32, i32
  }
}

</mosaic_0001>

<bundles_post_ra>
// kernel: tpu_custom_call.1
= control target key start
LH: loop header
LB: loop body
LE: loop exit
PB: predicated region body
PF: predicated region fallthrough
CT: control target
= control target key end

     0   :  { %9 = vsyncpa [#allocation4], 0  ;;  %s367_s0 = inlined_call_operand.hbm [shape: bf16[16,128], index: 0, kind: input, shape index: {}]   ;;  %s368_s1 = inlined_call_operand.hbm [shape: f32[16,16], index: 1, kind: input, shape index: {}]   ;;  %s369_s2 = inlined_call_operand.hbm [shape: f32[128,128], index: 2, kind: input, shape index: {}]   ;;  %s370_s3 = inlined_call_operand.vmem [shape: f32[1,128], index: 3, kind: input, shape index: {}]   ;;  %s371_s4 = inlined_call_operand.hbm [shape: f32[16,128], index: 4, kind: output, shape index: {}]  }
   0x1   :  { %10 = vsyncpa [#allocation7], 0  ;;  %s29_s17 = sshll.u32 %s368_s1, 4  ;;  %s30_s17 = int_to_ptr.hbm [resolvable:$true] %s29_s17 }
   0x2   :  { %11 = vsyncpa [#allocation5], 0  ;;  %s310_s18 = smov [#allocation6]   ;;  %s16_s22 = sshll.u32 %s367_s0, 4  ;;  %s17_s22 = int_to_ptr.hbm [resolvable:$true] %s16_s22 }
   0x3   :  { %s31_s19 = sshll.u32 %s310_s18, 4  ;;  %s311_s23 = smov 128   ;;  %s32_s19 = int_to_ptr.vmem [resolvable:$true] %s31_s19 }
   0x4   :  { %s312_s24 = smov 8   ;;  %s313_s25 = smov [#allocation3]  }
   0x5   :  { %37 = dma.hbm_to_vmem [thread:$0]  %s30_s17, 256, %s32_s19, [#allocation7], %s311_s23, %s311_s23, %s312_s24  }
   0x6   :  { %s18_s26 = sshll.u32 %s313_s25, 4  ;;  %s314_s1 = smov 64   ;;  %s19_s26 = int_to_ptr.vmem [resolvable:$true] %s18_s26 }
   0x7   :  { %s315_s27 = smov 4   ;;  %s42_s30 = sshll.u32 %s369_s2, 4  ;;  %s43_s30 = int_to_ptr.hbm [resolvable:$true] %s42_s30 }
   0x8   :  { %24 = dma.hbm_to_vmem [thread:$0]  %s17_s22, 128, %s19_s26, [#allocation4], %s314_s1, %s314_s1, %s315_s27  }
   0x9   :  { %s316_s5 = smov [#allocation8]  }
   0xa   :  { %s44_s0 = sshll.u32 %s316_s5, 4  ;;  %s45_s0 = int_to_ptr.vmem [resolvable:$true] %s44_s0 }
   0xb   :  { %50 = dma.hbm_to_vmem [thread:$0]  %s43_s30, 2048, %s45_s0, [#allocation7], %s311_s23, %s311_s23, %s312_s24  }
   0xc   :  { %304 = dma.done.wait [#allocation4], 128  }
   0xd   :  { %305 = vsyncadd [#allocation4], 4294967168 }
   0xe   :  { %306 = dma.done.wait [#allocation7], 2304  }
   0xf   :  { %307 = vsyncadd [#allocation7], 4294964992  ;;  %v182_v0 = vld [vmem:[#allocation3] sm:$0xff]  ;;  %v72_v1 = vld [vmem:[#allocation6] sm:$0xff]  ;;  %vm85_vm0 = vcmask 130048   ;;  %s317_s7 = smov [#allocation9]  }
  0x10   :  { %v73_v2 = vld [vmem:[#allocation6 + $0x8] sm:$0xff]  ;;  %v126_v5 = vld [vmem:[#allocation8 + $0x70] sm:$0xff]  ;;  %96 = vmatpush.bf16.msra.mxu0 %v182_v0  ;;  %v125_v6 = vld [vmem:[#allocation8 + $0x68] sm:$0xff]  ;;  %s161_s8 = sshll.u32 %s317_s7, 4  ;;  %s163_s11 = sshll.u32 %s371_s4, 4  ;;  %s162_s8 = int_to_ptr.vmem [resolvable:$true] %s161_s8  ;;  %s164_s11 = int_to_ptr.hbm [resolvable:$true] %s163_s11 }
  0x11   :  { %v74_v3 = vpack.c.bf16 %v73_v2, %v72_v1  ;;  %v127_v4 = vld [vmem:[#allocation8 + $0x78] sm:$0xff]  ;;  %v124_v7 = vld [vmem:[#allocation8 + $0x60] sm:$0xff]  ;;  %v122_v9 = vld [vmem:[#allocation8 + $0x50] sm:$0xff] }
  0x12   :  { %132 = vmatpush.msra.mxu1 %v127_v4  ;;  %183 = vmatpush.msra.mxu2 %v127_v4  ;;  %v123_v8 = vld [vmem:[#allocation8 + $0x58] sm:$0xff]  ;;  %v121_v10 = vld [vmem:[#allocation8 + $0x48] sm:$0xff]  ;;  %v120_v11 = vld [vmem:[#allocation8 + $0x40] sm:$0xff] }
  0x13   :  { %181 = vmatmul.msk.bf16.vlgmr.msra.gmra.mxu0 %vm85_vm0, %v74_v3  ;;  %v119_v12 = vld [vmem:[#allocation8 + $0x38] sm:$0xff]  ;;  %v118_v13 = vld [vmem:[#allocation8 + $0x30] sm:$0xff]  ;;  %v117_v14 = vld [vmem:[#allocation8 + $0x28] sm:$0xff] }
  0x14   :  { %133 = vmatpush.msra.mxu1 %v126_v5  ;;  %184 = vmatpush.msra.mxu2 %v126_v5  ;;  %v116_v15 = vld [vmem:[#allocation8 + $0x20] sm:$0xff]  ;;  %v115_v16 = vld [vmem:[#allocation8 + $0x18] sm:$0xff]  ;;  %v114_v17 = vld [vmem:[#allocation8 + $0x10] sm:$0xff] }
  0x15   :  { %v113_v18 = vld [vmem:[#allocation8 + $0x8] sm:$0xff]  ;;  %v112_v19 = vld [vmem:[#allocation8] sm:$0xff] }
  0x16   :  { %134 = vmatpush.msra.mxu1 %v125_v6  ;;  %185 = vmatpush.msra.mxu2 %v125_v6  ;;  %v207_v22 = vld [vmem:[%s370_s3] ss:$0 sm:$0xff] }
  0x18   :  { %135 = vmatpush.msra.mxu1 %v124_v7  ;;  %186 = vmatpush.msra.mxu2 %v124_v7 }
  0x1a   :  { %136 = vmatpush.msra.mxu1 %v123_v8  ;;  %187 = vmatpush.msra.mxu2 %v123_v8 }
  0x1c   :  { %137 = vmatpush.msra.mxu1 %v122_v9  ;;  %188 = vmatpush.msra.mxu2 %v122_v9 }
  0x1e   :  { %138 = vmatpush.msra.mxu1 %v121_v10  ;;  %189 = vmatpush.msra.mxu2 %v121_v10 }
  0x20   :  { %139 = vmatpush.msra.mxu1 %v120_v11  ;;  %190 = vmatpush.msra.mxu2 %v120_v11 }
  0x22   :  { %140 = vmatpush.msra.mxu1 %v119_v12  ;;  %191 = vmatpush.msra.mxu2 %v119_v12 }
  0x24   :  { %141 = vmatpush.msra.mxu1 %v118_v13  ;;  %192 = vmatpush.msra.mxu2 %v118_v13 }
  0x26   :  { %142 = vmatpush.msra.mxu1 %v117_v14  ;;  %193 = vmatpush.msra.mxu2 %v117_v14 }
  0x28   :  { %143 = vmatpush.msra.mxu1 %v116_v15  ;;  %194 = vmatpush.msra.mxu2 %v116_v15 }
  0x2a   :  { %144 = vmatpush.msra.mxu1 %v115_v16  ;;  %195 = vmatpush.msra.mxu2 %v115_v16 }
  0x2c   :  { %145 = vmatpush.msra.mxu1 %v114_v17  ;;  %196 = vmatpush.msra.mxu2 %v114_v17 }
  0x2e   :  { %146 = vmatpush.msra.mxu1 %v113_v18  ;;  %197 = vmatpush.msra.mxu2 %v113_v18 }
  0x30   :  { %147 = vmatpush.msra.mxu1 %v112_v19  ;;  %198 = vmatpush.msra.mxu2 %v112_v19 }
  0x90   :  { %v98_v20 = vpop.f32.mrf.mxu0 }
  0x91   :  { %148 = vmatmul.f32.vlgmr.msra.gmra.mxu1 %v98_v20 }
  0x98   :  { %v100_v21 = vpop.f32.mrf.mxu0 }
  0x99   :  { %151 = vmatmul.f32.vlgmr.msra.gmra.mxu2 %v100_v21 }
 0x10e   :  { %v149_v23 = vpop.f32.mrf.mxu1 }
 0x10f   :  { %v150_v24 = vadd.f32 %v207_v22, %v149_v23 }
 0x111   :  { %155 = vst [vmem:[#allocation9] sm:$0xff] %v150_v24 }
 0x11c   :  { %v152_v25 = vpop.f32.mrf.mxu2 }
 0x11d   :  { %v153_v26 = vadd.f32 %v207_v22, %v152_v25 }
 0x11f   :  { %156 = vst [vmem:[#allocation9 + $0x8] sm:$0xff] %v153_v26 }
 0x120   :  { %169 = dma.vmem_to_hbm [thread:$0]  %s162_s8, 256, %s164_s11, [#allocation5], %s311_s23, %s311_s23, %s312_s24  }
 0x121   :  { %308 = dma.done.wait [#allocation5], 256  }
 0x122   :  { %309 = vsyncadd [#allocation5], 4294967040 }
 0x123   :  { %174 = vsyncpa [#allocation4], 1 }
 0x124   :  { %175 = vsyncpa [#allocation7], 1 }
 0x125   :  { %176 = vsyncpa [#allocation5], 1 }

</bundles_post_ra>
